<compile_context>
chip_gen: v7x
topology: tpu7x:2x2x1
jax: 0.10.0
libtpu: 0.0.40
codegen_flags: <defaults>
</compile_context>

<pallas_src>
import functools

import jax
import jax.numpy as jnp
from jax import lax
from jax.experimental import pallas as pl
from jax.experimental.pallas import tpu as pltpu

_BN_EPS = 1e-5
_LANE = 128


def _round_up(x, m):
    return ((x + m - 1) // m) * m


def _pad_axis(x, axis, target):
    pad = target - x.shape[axis]
    if pad <= 0:
        return x
    widths = [(0, 0)] * x.ndim
    widths[axis] = (0, pad)
    return jnp.pad(x, widths)


@functools.lru_cache(maxsize=None)
def _vmem_capacity_bytes():
    """Per-core VMEM capacity; conservative 64 MiB fallback (valid on v7x)."""
    cap = 64 * 1024 * 1024
    try:
        info = pltpu.get_tpu_info()
        cap_attr = getattr(info, "vmem_capacity_bytes", None)
        if cap_attr:
            cap = int(cap_attr)
    except Exception:
        pass
    return cap


def _maybe_buffered_spec(block_shape, index_map, depth):
    """BlockSpec with requested pipelining depth; fall back to default (2)."""
    if depth is not None and depth != 2:
        buffered = getattr(pl, "Buffered", None)
        if buffered is not None:
            try:
                return pl.BlockSpec(block_shape, index_map,
                                    pipeline_mode=buffered(depth))
            except TypeError:
                pass
    return pl.BlockSpec(block_shape, index_map)


# ---------------------------------------------------------------------------
# Kernels
# ---------------------------------------------------------------------------

def _linrelbn_fast_kernel(a_ref, w_ref, p_ref, o_ref):
    """Single-pass output-feature tile (full K in one MXU call).

    a_ref: [N, K_p]   compute dtype, whole array resident in VMEM (1 buffer)
    w_ref: [K_p, TN]  compute dtype, pre-transposed weight tile (lane-dense out)
    p_ref: [8, TN]    f32 params: row 0 = bias, row 1 = gamma, row 2 = beta
    o_ref: [N, TN]
    """
    h = jnp.dot(a_ref[...], w_ref[...], preferred_element_type=jnp.float32)
    h = jnp.maximum(h + p_ref[0:1, :], 0.0)                 # bias + ReLU (VPU)

    # BatchNorm1d (training mode): per-feature batch stats, biased variance.
    # One fused pass: var = E[h^2] - E[h]^2 (h >= 0 post-ReLU, f32 accumulate).
    inv_n = jnp.float32(1.0 / h.shape[0])
    mean = jnp.sum(h, axis=0, keepdims=True) * inv_n
    sumsq = jnp.sum(h * h, axis=0, keepdims=True) * inv_n
    var = jnp.maximum(sumsq - mean * mean, 0.0)

    # Fold gamma/beta/mean/var into a single per-feature scale & shift.
    scale = p_ref[1:2, :] * lax.rsqrt(var + _BN_EPS)
    shift = p_ref[2:3, :] - mean * scale
    o_ref[...] = (h * scale + shift).astype(o_ref.dtype)


def _linrelbn_ktiled_kernel(a_ref, w_ref, p_ref, o_ref, acc_ref):
    """K-tiled fallback: accumulate A @ W in f32 scratch, BN epilogue at last k.

    a_ref: [N, TK], w_ref: [TK, TN], p_ref: [8, TN], o_ref: [N, TN]
    acc_ref: [N, TN] f32 scratch (resident across the 'arbitrary' k axis).
    """
    k = pl.program_id(1)

    @pl.when(k == 0)
    def _():
        acc_ref[...] = jnp.zeros_like(acc_ref)

    acc_ref[...] += jnp.dot(a_ref[...], w_ref[...],
                            preferred_element_type=jnp.float32)

    @pl.when(k == pl.num_programs(1) - 1)
    def _():
        h = jnp.maximum(acc_ref[...] + p_ref[0:1, :], 0.0)
        inv_n = jnp.float32(1.0 / h.shape[0])
        mean = jnp.sum(h, axis=0, keepdims=True) * inv_n
        sumsq = jnp.sum(h * h, axis=0, keepdims=True) * inv_n
        var = jnp.maximum(sumsq - mean * mean, 0.0)
        scale = p_ref[1:2, :] * lax.rsqrt(var + _BN_EPS)
        shift = p_ref[2:3, :] - mean * scale
        o_ref[...] = (h * scale + shift).astype(o_ref.dtype)


# ---------------------------------------------------------------------------
# Wrapper
# ---------------------------------------------------------------------------

@functools.partial(jax.jit,
                   static_argnames=("compute_dtype", "out_dtype", "_force_plan"))
def linrelbn_forward(a, weight, bias, gamma, beta, *,
                     compute_dtype=jnp.bfloat16, out_dtype=None,
                     _force_plan=None):
    """y = BatchNorm1d(ReLU(Linear(a))), BN in training mode.

    a:      [N, in_f]
    weight: [out_f, in_f]   (PyTorch nn.Linear layout)
    bias, gamma, beta: [out_f]
    out_dtype: output dtype (default: a.dtype).  Pass bf16 to halve writeback.
    """
    n, in_f = a.shape
    out_f = weight.shape[0]
    out_dt = jnp.dtype(a.dtype) if out_dtype is None else jnp.dtype(out_dtype)

    # Lane-dense padding of both matmul minor dims (full MXU columns, unmasked
    # stores).  Padded features normalize to exactly 0 and are sliced away.
    in_p = _round_up(in_f, _LANE)
    out_p = _round_up(out_f, _LANE)

    a_p = _pad_axis(a, 1, in_p).astype(compute_dtype)
    # Pre-transpose ONCE in the wrapper -> kernel does [N,K] @ [K,TN] directly.
    w_p = _pad_axis(_pad_axis(weight.T, 0, in_p), 1, out_p).astype(compute_dtype)
    # Single parameter slab [8, out_p]: rows 0..2 = bias, gamma, beta.
    params = _pad_axis(
        _pad_axis(jnp.stack([bias, gamma, beta], axis=0).astype(jnp.float32),
                  1, out_p),
        0, 8)

    csize = jnp.dtype(compute_dtype).itemsize
    osize = out_dt.itemsize

    cap = _vmem_capacity_bytes()          # per-generation, not a blanket 64 MiB
    budget = int(cap * 0.80)              # ~20% headroom

    tn_cands = [t for t in (512, 256, 128) if out_p % t == 0]
    tk_cands = [t for t in (512, 256, 128) if in_p % t == 0]

    # -------------------- fast path: resident A, feature-only grid ----------
    def fast_est(tn, wbufs):
        return (n * in_p * csize             # A: whole array, single buffer
                + wbufs * tn * in_p * csize  # weight tiles
                + 2 * 8 * tn * 4             # param slab tiles
                + 2 * n * tn * osize         # output tiles
                + 2 * n * tn * 4)            # f32 h + one elementwise temp

    fast_tn = None
    if _force_plan != "ktiled":
        # Prefer >=4 feature tiles (megacore + DMA/compute overlap), then >=2.
        for min_steps in (4, 2, 1):
            fits = [t for t in tn_cands
                    if out_p // t >= min_steps and fast_est(t, 2) <= budget]
            if fits:
                fast_tn = max(fits)
                break

    if fast_tn is not None:
        steps = out_p // fast_tn
        w_depth = 3 if (steps >= 3 and fast_est(fast_tn, 3) <= budget) else None
        est = fast_est(fast_tn, 3 if w_depth else 2)
        vmem_limit = int(min(0.9 * cap, max(est + (4 << 20), 32 << 20)))

        out = pl.pallas_call(
            _linrelbn_fast_kernel,
            out_shape=jax.ShapeDtypeStruct((n, out_p), out_dt),
            grid=(steps,),
            in_specs=[
                # A: full array in VMEM, single buffer (no pointless 2x copy).
                pl.BlockSpec(memory_space=pltpu.MemorySpace.VMEM),
                # Weight tile [K_p, TN]; deeper buffering when VMEM allows.
                _maybe_buffered_spec((in_p, fast_tn), lambda j: (0, j), w_depth),
                pl.BlockSpec((8, fast_tn), lambda j: (0, j)),
            ],
            out_specs=pl.BlockSpec((n, fast_tn), lambda j: (0, j)),
            compiler_params=pltpu.CompilerParams(
                dimension_semantics=("parallel",),   # feature tiles independent
                vmem_limit_bytes=vmem_limit),
        )(a_p, w_p, params)
        return out[:, :out_f]

    # -------------------- fallback: K-tiled with f32 accumulator ------------
    def k_est(tn, tk):
        return (2 * n * tk * csize           # A tiles (double-buffered)
                + 2 * tk * tn * csize        # weight tiles
                + 2 * 8 * tn * 4             # param slab tiles
                + 2 * n * tn * osize         # output tiles
                + n * tn * 4                 # f32 accumulator scratch
                + 2 * n * tn * 4)            # epilogue f32 h + temp

    plan = None
    for min_steps in (4, 2, 1):
        for tn in tn_cands:
            if out_p // tn < min_steps:
                continue
            for tk in tk_cands:
                if k_est(tn, tk) <= budget:
                    plan = (tn, tk)
                    break
            if plan:
                break
        if plan:
            break
    if plan is None:
        # TODO(synk): very large N needs an N-tiled two-pass BN; use the
        # smallest tiles and let the compiler try.
        plan = (128, 128)
    tn, tk = plan
    est = k_est(tn, tk)
    vmem_limit = int(min(0.9 * cap, max(est + (4 << 20), 32 << 20)))

    out = pl.pallas_call(
        _linrelbn_ktiled_kernel,
        out_shape=jax.ShapeDtypeStruct((n, out_p), out_dt),
        grid=(out_p // tn, in_p // tk),       # reduction axis last
        in_specs=[
            pl.BlockSpec((n, tk), lambda j, k: (0, k)),
            pl.BlockSpec((tk, tn), lambda j, k: (k, j)),
            pl.BlockSpec((8, tn), lambda j, k: (0, j)),
        ],
        out_specs=pl.BlockSpec((n, tn), lambda j, k: (0, j)),
        scratch_shapes=[pltpu.VMEM((n, tn), jnp.float32)],
        compiler_params=pltpu.CompilerParams(
            dimension_semantics=("parallel", "arbitrary"),
            vmem_limit_bytes=vmem_limit),
    )(a_p, w_p, params)
    return out[:, :out_f]


# ---------------------------------------------------------------------------
# Reference & tests
# ---------------------------------------------------------------------------

def _reference(a, weight, bias, gamma, beta, compute_dtype=jnp.float32):
    """Pure-JAX reference; `compute_dtype` mirrors the kernel's matmul cast."""
    a_c = a.astype(compute_dtype).astype(jnp.float32)
    w_c = weight.astype(compute_dtype).astype(jnp.float32)
    h = a_c @ w_c.T + bias
    h = jnp.maximum(h, 0.0)
    mean = jnp.mean(h, axis=0, keepdims=True)
    var = jnp.mean((h - mean) ** 2, axis=0, keepdims=True)  # biased, train mode
    return gamma * (h - mean) / jnp.sqrt(var + _BN_EPS) + beta


def _make_inputs(key, n, in_f, out_f):
    k_a, k_w, k_b, k_g, k_be = jax.random.split(key, 5)
    a = jax.random.normal(k_a, (n, in_f), dtype=jnp.float32)
    bound = 1.0 / float(in_f) ** 0.5          # PyTorch-style Linear init bound
    weight = jax.random.uniform(k_w, (out_f, in_f), jnp.float32, -bound, bound)
    bias = jax.random.uniform(k_b, (out_f,), jnp.float32, -bound, bound)
    gamma = 1.0 + 0.1 * jax.random.normal(k_g, (out_f,), jnp.float32)
    beta = 0.1 * jax.random.normal(k_be, (out_f,), jnp.float32)
    return a, weight, bias, gamma, beta


if __name__ == "__main__":
    root = jax.random.PRNGKey(0)
    k1, k2, k3 = jax.random.split(root, 3)

    # 1) Small shapes (batch=8, in=32, out=64), f32 matmul path: exact check.
    a, w, b, g, be = _make_inputs(k1, 8, 32, 64)
    out = jax.block_until_ready(
        linrelbn_forward(a, w, b, g, be, compute_dtype=jnp.float32))
    ref = _reference(a, w, b, g, be, compute_dtype=jnp.float32)
    assert out.shape == (8, 64)
    assert jnp.allclose(out, ref, atol=1e-4, rtol=1e-4), "f32 fast path mismatch"

    # 1b) Default bf16 matmul path (reference mirrors the bf16 input cast).
    out = jax.block_until_ready(linrelbn_forward(a, w, b, g, be))
    ref = _reference(a, w, b, g, be, compute_dtype=jnp.bfloat16)
    assert jnp.allclose(out, ref, atol=2e-3, rtol=2e-3), "bf16 fast path mismatch"

    # 2) Multi-step feature grid (out_p=256 -> 2 tiles of 128, "parallel").
    a, w, b, g, be = _make_inputs(k2, 16, 64, 256)
    out = jax.block_until_ready(linrelbn_forward(a, w, b, g, be))
    ref = _reference(a, w, b, g, be, compute_dtype=jnp.bfloat16)
    assert out.shape == (16, 256)
    assert jnp.allclose(out, ref, atol=2e-3, rtol=2e-3), "multi-tile fast path mismatch"

    # 3) K-tiled fallback kernel (forced): in_p=384 -> 3 reduction steps.
    a, w, b, g, be = _make_inputs(k3, 16, 384, 256)
    out = jax.block_until_ready(
        linrelbn_forward(a, w, b, g, be, _force_plan="ktiled"))
    ref = _reference(a, w, b, g, be, compute_dtype=jnp.bfloat16)
    assert out.shape == (16, 256)
    assert jnp.allclose(out, ref, atol=2e-3, rtol=2e-3), "K-tiled fallback mismatch"

    print("KERNEL_OK")
</pallas_src>

<mosaic_0001>
module attributes {stable_mosaic.version = 11 : i64} {
  func.func @_linrelbn_fast_kernel(%arg0: i32, %arg1: memref<8x128xf32, #tpu.memory_space<vmem>>, %arg2: memref<128x128xf32, #tpu.memory_space<vmem>>, %arg3: memref<8x128xf32, #tpu.memory_space<vmem>>, %arg4: memref<8x128xf32, #tpu.memory_space<vmem>>) attributes {dimension_semantics = [#tpu.dimension_semantics<parallel>], iteration_bounds = array<i64: 1>, scalar_prefetch = 0 : i64, scratch_operands = 0 : i64, tpu.core_type = #tpu.core_type<tc>, window_params = [{pipeline_mode = #tpu.pipeline_mode<synchronous>, transform_indices = @transform_0, window_bounds = array<i64: 8, 128>}, {transform_indices = @transform_1, window_bounds = array<i64: 128, 128>}, {transform_indices = @transform_2, window_bounds = array<i64: 8, 128>}, {transform_indices = @transform_3, window_bounds = array<i64: 8, 128>}]} {
    %c0 = arith.constant 0 : index
    %c0_0 = arith.constant 0 : index
    %0 = vector.load %arg1[%c0, %c0_0] : memref<8x128xf32, #tpu.memory_space<vmem>>, vector<8x128xf32>
    %c0_1 = arith.constant 0 : index
    %c0_2 = arith.constant 0 : index
    %1 = vector.load %arg2[%c0_1, %c0_2] : memref<128x128xf32, #tpu.memory_space<vmem>>, vector<128x128xf32>
    %cst = arith.constant dense<0.000000e+00> : vector<8x128xf32>
    %2 = tpu.matmul %0, %1, %cst {dimension_numbers = #tpu.dot_dimension_numbers<[1], [0], [0], [1], [0, 0, 1, 1], [], []>} : vector<8x128xf32>, vector<128x128xf32>, vector<8x128xf32> -> vector<8x128xf32>
    %c0_3 = arith.constant 0 : index
    %c0_4 = arith.constant 0 : index
    %3 = vector.load %arg3[%c0_3, %c0_4] : memref<8x128xf32, #tpu.memory_space<vmem>>, vector<1x128xf32>
    %4 = vector.broadcast %3 : vector<1x128xf32> to vector<8x128xf32>
    %5 = arith.addf %2, %4 : vector<8x128xf32>
    %cst_5 = arith.constant 0.000000e+00 : f32
    %6 = vector.broadcast %cst_5 : f32 to vector<8x128xf32>
    %7 = arith.maximumf %5, %6 : vector<8x128xf32>
    %cst_6 = arith.constant dense<0.000000e+00> : vector<128xf32>
    %8 = vector.multi_reduction <add>, %7, %cst_6 [0] : vector<8x128xf32> to vector<128xf32>
    %9 = vector.shape_cast %8 : vector<128xf32> to vector<1x128xf32>
    %cst_7 = arith.constant 1.250000e-01 : f32
    %10 = vector.broadcast %cst_7 : f32 to vector<1x128xf32>
    %11 = arith.mulf %9, %10 : vector<1x128xf32>
    %12 = arith.mulf %7, %7 : vector<8x128xf32>
    %cst_8 = arith.constant dense<0.000000e+00> : vector<128xf32>
    %13 = vector.multi_reduction <add>, %12, %cst_8 [0] : vector<8x128xf32> to vector<128xf32>
    %14 = vector.shape_cast %13 : vector<128xf32> to vector<1x128xf32>
    %cst_9 = arith.constant 1.250000e-01 : f32
    %15 = vector.broadcast %cst_9 : f32 to vector<1x128xf32>
    %16 = arith.mulf %14, %15 : vector<1x128xf32>
    %17 = arith.mulf %11, %11 : vector<1x128xf32>
    %18 = arith.subf %16, %17 : vector<1x128xf32>
    %cst_10 = arith.constant 0.000000e+00 : f32
    %19 = vector.broadcast %cst_10 : f32 to vector<1x128xf32>
    %20 = arith.maximumf %18, %19 : vector<1x128xf32>
    %c1 = arith.constant 1 : index
    %c0_11 = arith.constant 0 : index
    %21 = vector.load %arg3[%c1, %c0_11] : memref<8x128xf32, #tpu.memory_space<vmem>>, vector<1x128xf32>
    %cst_12 = arith.constant 9.99999974E-6 : f32
    %22 = vector.broadcast %cst_12 : f32 to vector<1x128xf32>
    %23 = arith.addf %20, %22 : vector<1x128xf32>
    %24 = math.rsqrt %23 : vector<1x128xf32>
    %25 = arith.mulf %21, %24 : vector<1x128xf32>
    %c2 = arith.constant 2 : index
    %c0_13 = arith.constant 0 : index
    %26 = vector.load %arg3[%c2, %c0_13] : memref<8x128xf32, #tpu.memory_space<vmem>>, vector<1x128xf32>
    %27 = arith.mulf %11, %25 : vector<1x128xf32>
    %28 = arith.subf %26, %27 : vector<1x128xf32>
    %29 = vector.broadcast %25 : vector<1x128xf32> to vector<8x128xf32>
    %30 = arith.mulf %7, %29 : vector<8x128xf32>
    %31 = vector.broadcast %28 : vector<1x128xf32> to vector<8x128xf32>
    %32 = arith.addf %30, %31 : vector<8x128xf32>
    %c0_14 = arith.constant 0 : index
    %c0_15 = arith.constant 0 : index
    %33 = vector.load %arg4[%c0_14, %c0_15] : memref<8x128xf32, #tpu.memory_space<vmem>>, vector<8x128xf32>
    tpu.vector_store %arg4[%c0_14, %c0_15], %32 {strides = array<i32>} : memref<8x128xf32, #tpu.memory_space<vmem>>, vector<8x128xf32>,
    return
  }
  func.func @transform_0(%arg0: i32) -> (i32, i32) {
    %c0_i32 = arith.constant 0 : i32
    %c0_i32_0 = arith.constant 0 : i32
    %c0_i32_1 = arith.constant 0 : i32
    return %c0_i32, %c0_i32_0 : i32, i32
  }
  func.func @transform_1(%arg0: i32) -> (i32, i32) {
    %c0_i32 = arith.constant 0 : i32
    %c0_i32_0 = arith.constant 0 : i32
    return %c0_i32, %arg0 : i32, i32
  }
  func.func @transform_2(%arg0: i32) -> (i32, i32) {
    %c0_i32 = arith.constant 0 : i32
    %c0_i32_0 = arith.constant 0 : i32
    return %c0_i32, %arg0 : i32, i32
  }
  func.func @transform_3(%arg0: i32) -> (i32, i32) {
    %c0_i32 = arith.constant 0 : i32
    %c0_i32_0 = arith.constant 0 : i32
    return %c0_i32, %arg0 : i32, i32
  }
}

</mosaic_0001>

<bundles_post_ra>
// kernel: linrelbn_forward.1
= control target key start
LH: loop header
LB: loop body
LE: loop exit
PB: predicated region body
PF: predicated region fallthrough
CT: control target
= control target key end

     0   :  { %v265_v3 = vmov 0.0|0.0   ;;  %vm266_vm0 = vmmov 0   ;;  %v267_v6 = vmov 0.0   ;;  %s361_s0 = inlined_call_operand.vmem [shape: f32[8,128], index: 0, kind: input, shape index: {}]   ;;  %s362_s1 = inlined_call_operand.vmem [shape: f32[128,128], index: 1, kind: input, shape index: {}]   ;;  %s363_s2 = inlined_call_operand.vmem [shape: f32[8,128], index: 2, kind: input, shape index: {}]   ;;  %s364_s3 = inlined_call_operand.hbm [shape: f32[8,128], index: 3, kind: output, shape index: {}]  }
   0x1   :  { %v16_v0 = vld [vmem:[%s362_s1] sm:$0xff]  ;;  %v17_v1 = vld [vmem:[%s362_s1 + $0x8] sm:$0xff]  ;;  %v18_v2 = vld [vmem:[%s362_s1 + $0x10] sm:$0xff]  ;;  %211 = vmatprep.subr.bf16.mxu0 %v265_v3  ;;  %208 = vmatprep.mubr.msk.f32.mxu0 %vm266_vm0, %v267_v6 }
   0x2   :  { %v212_v4 = vpack.c.bf16 %v17_v1, %v16_v0  ;;  %v19_v5 = vld [vmem:[%s362_s1 + $0x18] sm:$0xff]  ;;  %v20_v8 = vld [vmem:[%s362_s1 + $0x20] sm:$0xff]  ;;  %v21_v9 = vld [vmem:[%s362_s1 + $0x28] sm:$0xff] }
   0x3   :  { %v215_v7 = vpack.c.bf16 %v19_v5, %v18_v2 }
   0x4   :  { %213 = vmatpush3.bf16.msra.mxu0 %v212_v4 }
   0x5   :  { %214 = vmatprep.subr.bf16.mxu0 %v265_v3 }
   0x6   :  { %8 = vsyncpa [#allocation3], 0  ;;  %v218_v10 = vpack.c.bf16 %v21_v9, %v20_v8  ;;  %v22_v11 = vld [vmem:[%s362_s1 + $0x30] sm:$0xff]  ;;  %v23_v12 = vld [vmem:[%s362_s1 + $0x38] sm:$0xff]  ;;  %v133_v51 = vlaneseq  ;;  %s268_s23 = smov [#allocation2]  }
   0x7   :  { %v221_v13 = vpack.c.bf16 %v23_v12, %v22_v11  ;;  %v24_v14 = vld [vmem:[%s362_s1 + $0x40] sm:$0xff]  ;;  %v25_v15 = vld [vmem:[%s362_s1 + $0x48] sm:$0xff]  ;;  %v26_v17 = vld [vmem:[%s362_s1 + $0x50] sm:$0xff]  ;;  %s150_s24 = sshll.u32 %s268_s23, 4  ;;  %s151_s24 = int_to_ptr.vmem [resolvable:$true] %s150_s24 }
   0x8   :  { %216 = vmatpush3.bf16.msra.mxu0 %v215_v7  ;;  %v224_v16 = vpack.c.bf16 %v25_v15, %v24_v14  ;;  %v27_v18 = vld [vmem:[%s362_s1 + $0x58] sm:$0xff]  ;;  %v28_v20 = vld [vmem:[%s362_s1 + $0x60] sm:$0xff]  ;;  %v29_v21 = vld [vmem:[%s362_s1 + $0x68] sm:$0xff]  ;;  %v134_v52 = vshrl.u32 %v133_v51, 7  ;;  %s241_s25 = scalar_lea.vmem %s151_s24, 128  ;;  %p246_p1 = scmp.lt.s32.totalorder %s151_s24, %s151_s24 }
   0x9   :  { %217 = vmatprep.subr.bf16.mxu0 %v265_v3  ;;  %v227_v19 = vpack.c.bf16 %v27_v18, %v26_v17  ;;  %v230_v22 = vpack.c.bf16 %v29_v21, %v28_v20  ;;  %v30_v23 = vld [vmem:[%s362_s1 + $0x70] sm:$0xff]  ;;  %v31_v24 = vld [vmem:[%s362_s1 + $0x78] sm:$0xff]  ;;  %v15_v26 = vld [vmem:[%s361_s0] sm:$0xff]  ;;  %p242_p0 = scmp.ne.s32.totalorder %s151_s24, %s241_s25  ;;  %p247_p2 = scmp.lt.s32.totalorder %s241_s25, %s241_s25 }
   0xa   :  { %v233_v25 = vpack.c.bf16 %v31_v24, %v30_v23  ;;  %v158_v27 = vld [vmem:[%s363_s2] ss:$0 sm:$0xff]  ;;  %v126_v53 = vld [vmem:[%s363_s2 + $0x1] sm:$0x1]  ;;  %v135_v54 = vsub.s32 0, %v134_v52 }
   0xb   :  { %v130_v57 = vld [vmem:[%s363_s2 + $0x2] sm:$0x1]  ;;  %p248_p3 = por %p247_p2, %p246_p1 }
   0xc   :  { %219 = vmatpush3.bf16.msra.mxu0 %v218_v10 }
   0xd   :  { %220 = vmatprep.subr.bf16.mxu0 %v265_v3  ;;  %p249_p4 = pnand %p248_p3, %p242_p0 }
  0x10   :  { %222 = vmatpush3.bf16.msra.mxu0 %v221_v13 }
  0x11   :  { %223 = vmatprep.subr.bf16.mxu0 %v265_v3 }
  0x14   :  { %225 = vmatpush3.bf16.msra.mxu0 %v224_v16 }
  0x15   :  { %226 = vmatprep.subr.bf16.mxu0 %v265_v3 }
  0x18   :  { %228 = vmatpush3.bf16.msra.mxu0 %v227_v19 }
  0x19   :  { %229 = vmatprep.subr.bf16.mxu0 %v265_v3 }
  0x1c   :  { %231 = vmatpush3.bf16.msra.mxu0 %v230_v22 }
  0x1d   :  { %232 = vmatprep.subr.bf16.mxu0 %v265_v3 }
  0x20   :  { %234 = vmatpush3.bf16.msra.mxu0 %v233_v25 }
  0x23   :  { %209 = vmatmul.mubr.f32.vlgmr.msra.gmra.mrb[0].mxu0 %v15_v26 }
  0xf6   :  { %v103_v28 = vpop.f32.mrb[0].mxu0 }
  0xf7   :  { %v104_v29 = vadd.f32 %v158_v27, %v103_v28  ;;  %v210_v30 = vpop.f32.mrb[1].mxu0 }
  0xf9   :  { %v107_v31 = vmax.f32 %v104_v29, 0.0 }
  0xfb   :  { %v108_v32 = vrot.slane %v107_v31, 4  ;;  %v115_v33 = vmul.f32 %v107_v31, %v107_v31 }
  0xfd   :  { %v109_v34 = vadd.f32 %v108_v32, %v107_v31  ;;  %v116_v35 = vrot.slane %v115_v33, 4 }
  0xff   :  { %v110_v36 = vrot.slane %v109_v34, 2  ;;  %v117_v37 = vadd.f32 %v116_v35, %v115_v33 }
 0x101   :  { %v111_v38 = vadd.f32 %v110_v36, %v109_v34  ;;  %v118_v39 = vrot.slane %v117_v37, 2 }
 0x103   :  { %v119_v40 = vadd.f32 %v118_v39, %v117_v37  ;;  %v112_v41 = vrot.slane %v111_v38, 1 }
 0x105   :  { %v120_v42 = vrot.slane %v119_v40, 1  ;;  %v113_v43 = vadd.f32 %v112_v41, %v111_v38 }
 0x107   :  { %v121_v44 = vadd.f32 %v120_v42, %v119_v40  ;;  %v114_v45 = vmul.f32 0.125, %v113_v43 }
 0x109   :  { %v122_v46 = vmul.f32 0.125, %v121_v44  ;;  %v123_v47 = vmul.f32 %v114_v45, %v114_v45 }
 0x10b   :  { %v124_v48 = vsub.f32 %v122_v46, %v123_v47 }
 0x10d   :  { %v125_v49 = vmax.f32 %v124_v48, 0.0 }
 0x10f   :  { %v127_v50 = vadd.f32 1e-05, %v125_v49 }
 0x111   :  { %239 = vrsqrt.f32 %v127_v50 }
 0x11b   :  { %v240_v55 = vpop.eup %239 }
 0x11c   :  { %v129_v56 = vmul.f32 %v240_v55, %v126_v53 }
 0x11e   :  { %v131_v58 = vmul.f32 %v129_v56, %v114_v45  ;;  %v136_v59 = vrot.slane %v129_v56, %v135_v54 }
 0x120   :  { %v132_v60 = vsub.f32 %v130_v57, %v131_v58  ;;  %v137_v61 = vmul.f32 %v136_v59, %v107_v31 }
 0x122   :  { %v141_v62 = vrot.slane %v132_v60, %v135_v54 }
 0x124   :  { %v142_v63 = vadd.f32 %v141_v62, %v137_v61 }
 0x126   :  { %143 = vst [vmem:[#allocation2] sm:$0xff] %v142_v63 }
 0x127   :  { %252 = shalt.err (!%p249_p4)
}
 0x128   :  { %s253_s2 = scalar_lea.hbm %s364_s3, 128 }
 0x129   :  { %p254_p5 = scmp.ne.s32.totalorder %s364_s3, %s253_s2  ;;  %p257_p6 = scmp.lt.u32.totalorder %s253_s2, %s364_s3 }
 0x12b   :  { %p259_p7 = pnand %p257_p6, %p254_p5 }
 0x12d   :  { %262 = shalt.err (!%p259_p7)
}
 0x12e   :  { %153 = dma.vmem_to_hbm [thread:$0]  %s151_s24, 128, %s364_s3, [#allocation3]  }
 0x12f   :  { %263 = dma.done.wait [#allocation3], 128  }
 0x130   :  { %264 = vsyncadd [#allocation3], 4294967168 }
 0x131   :  { %157 = vsyncpa [#allocation3], 1 }

</bundles_post_ra>
